<compile_context>
chip_gen: v7x
topology: tpu7x:2x2x1
jax: 0.10.0
libtpu: 0.0.40
codegen_flags: <defaults>
</compile_context>

<pallas_src>
import jax
import jax.numpy as jnp
from jax.experimental import pallas as pl
from jax.experimental.pallas import tpu as pltpu

INPUT_DIM = 10
OUTPUT_DIM = 1

_SUBLANES = 8            # f32 sublanes per vreg
_LANE = 128              # lanes per vreg
_MAX_BLOCK_LANES = 4096  # 8 * 4096 = 32768 batch rows per grid step (~1.25 MiB x-tile)
_MIN_BLOCK_LANES = _LANE
_TARGET_BLOCKS = 8       # keep >= 8 parallel tiles for big B (v7x: 2 TCs + pipelining)


def _cdiv(a: int, b: int) -> int:
    return -(-a // b)


def _round_up(x: int, m: int) -> int:
    return ((x + m - 1) // m) * m


def _linear_sigmoid_kernel(w_ref, b_ref, x_ref, o_ref):
    # w_ref: SMEM (D,)   b_ref: SMEM (1,)
    # x_ref: VMEM (D, 8, blk)  -- batch packed on (sublane, lane) axes
    # o_ref: VMEM (8, blk)     -- lane-dense, fully-packed output vregs
    acc = x_ref[0] * w_ref[0]                 # (8, blk) scalar*slab on the VPU
    for d in range(1, INPUT_DIM):             # static unroll: 10 FMAs, full vregs
        acc = acc + x_ref[d] * w_ref[d]
    y = acc + b_ref[0]
    # sigmoid(y) = 0.5 * tanh(y/2) + 0.5 : a single EUP op per vreg.
    o_ref[...] = (0.5 * jnp.tanh(0.5 * y) + 0.5).astype(o_ref.dtype)


@jax.jit
def simple_llm_forward(x, weight, bias):
    """x: [B, D] f32; weight: [O, D] f32 (PyTorch nn.Linear layout); bias: [O] f32."""
    B, D = x.shape
    O = weight.shape[0]
    assert D == INPUT_DIM and O == OUTPUT_DIM

    # ---- static block sizing ------------------------------------------------
    lanes_min = _round_up(_cdiv(B, _SUBLANES), _LANE)          # lanes to hold B rows
    blk = _round_up(_cdiv(lanes_min, _TARGET_BLOCKS), _LANE)   # aim for >= 8 blocks
    blk = max(_MIN_BLOCK_LANES, min(_MAX_BLOCK_LANES, blk))    # 128 <= blk <= 4096
    lanes_total = _round_up(lanes_min, blk)
    num_blocks = lanes_total // blk
    B_pad = _SUBLANES * lanes_total

    # ---- layout: batch on the lane axis, 8 batch sub-rows per vreg ----------
    # pad -> transpose is a single fused XLA copy pass; the (D, 8, lanes) view
    # of the transposed buffer is a free (row-major-compatible) reshape.
    x_pad = jnp.pad(x.astype(jnp.float32), ((0, B_pad - B), (0, 0)))   # (B_pad, D)
    xT = x_pad.T.reshape(D, _SUBLANES, lanes_total)                    # (D, 8, L)

    w_vec = weight.reshape(D).astype(jnp.float32)   # (10,) -> SMEM scalars
    b_vec = bias.reshape(O).astype(jnp.float32)     # (1,)  -> SMEM scalar

    cost = pl.CostEstimate(
        flops=21 * B_pad,                                    # 10 mul + 10 add + epilogue
        transcendentals=B_pad,                               # 1 tanh per row
        bytes_accessed=(INPUT_DIM + OUTPUT_DIM) * 4 * B_pad  # x read + out write
        + 4 * (INPUT_DIM + OUTPUT_DIM),                      # weights + bias
    )

    out_packed = pl.pallas_call(
        _linear_sigmoid_kernel,
        out_shape=jax.ShapeDtypeStruct((_SUBLANES, lanes_total), jnp.float32),
        grid_spec=pl.GridSpec(
            grid=(num_blocks,),
            in_specs=[
                pl.BlockSpec(memory_space=pltpu.MemorySpace.SMEM),       # weights
                pl.BlockSpec(memory_space=pltpu.MemorySpace.SMEM),       # bias
                pl.BlockSpec((D, _SUBLANES, blk), lambda i: (0, 0, i)),  # x tile
            ],
            out_specs=pl.BlockSpec((_SUBLANES, blk), lambda i: (0, i)),  # lane-dense
        ),
        compiler_params=pltpu.CompilerParams(
            dimension_semantics=("parallel",),    # v7x: split batch tiles across 2 TCs
        ),
        cost_estimate=cost,
    )(w_vec, b_vec, xT)

    # Padded rows compute sigmoid(bias) (finite) and are sliced off here.
    return out_packed.reshape(B_pad)[:B].reshape(B, OUTPUT_DIM)


def init_params(key, input_dim, output_dim):
    # Deterministic init mirroring nn.Linear default: U(-1/sqrt(fan_in), +1/sqrt(fan_in))
    kw, kb = jax.random.split(key)
    bound = 1.0 / (input_dim ** 0.5)
    weight = jax.random.uniform(kw, (output_dim, input_dim), jnp.float32,
                                minval=-bound, maxval=bound)
    bias = jax.random.uniform(kb, (output_dim,), jnp.float32,
                              minval=-bound, maxval=bound)
    return weight, bias


if __name__ == "__main__":
    key = jax.random.PRNGKey(0)
    k_x, k_p = jax.random.split(key)

    B = 8
    x = jax.random.normal(k_x, (B, INPUT_DIM), jnp.float32)
    weight, bias = init_params(k_p, INPUT_DIM, OUTPUT_DIM)

    out = simple_llm_forward(x, weight, bias)
    jax.block_until_ready(out)

    # Sanity check against a pure-JAX reference of the same forward pass.
    ref = jax.nn.sigmoid(x @ weight.T + bias)
    assert out.shape == (B, OUTPUT_DIM)
    assert jnp.allclose(out, ref, atol=1e-5, rtol=1e-5), (out, ref)

    print("KERNEL_OK")
</pallas_src>

<mosaic_0001>
module attributes {stable_mosaic.version = 11 : i64} {
  func.func @_linear_sigmoid_kernel(%arg0: i32, %arg1: memref<10xf32, #tpu.memory_space<smem>>, %arg2: memref<1xf32, #tpu.memory_space<smem>>, %arg3: memref<10x8x128xf32, #tpu.memory_space<vmem>>, %arg4: memref<8x128xf32, #tpu.memory_space<vmem>>) attributes {dimension_semantics = [#tpu.dimension_semantics<parallel>], iteration_bounds = array<i64: 1>, scalar_prefetch = 0 : i64, scratch_operands = 0 : i64, tpu.core_type = #tpu.core_type<tc>, window_params = [{transform_indices = @transform_0, window_bounds = array<i64: 10>}, {transform_indices = @transform_1, window_bounds = array<i64: 1>}, {transform_indices = @transform_2, window_bounds = array<i64: 10, 8, 128>}, {transform_indices = @transform_3, window_bounds = array<i64: 8, 128>}]} {
    %c0 = arith.constant 0 : index
    %c0_0 = arith.constant 0 : index
    %c0_1 = arith.constant 0 : index
    %0 = vector.load %arg3[%c0, %c0_0, %c0_1] : memref<10x8x128xf32, #tpu.memory_space<vmem>>, vector<1x8x128xf32>
    %1 = vector.shape_cast %0 : vector<1x8x128xf32> to vector<8x128xf32>
    %c0_2 = arith.constant 0 : index
    %2 = memref.load %arg1[%c0_2] : memref<10xf32, #tpu.memory_space<smem>>
    %3 = vector.broadcast %2 : f32 to vector<8x128xf32>
    %4 = arith.mulf %1, %3 : vector<8x128xf32>
    %c1 = arith.constant 1 : index
    %c0_3 = arith.constant 0 : index
    %c0_4 = arith.constant 0 : index
    %5 = vector.load %arg3[%c1, %c0_3, %c0_4] : memref<10x8x128xf32, #tpu.memory_space<vmem>>, vector<1x8x128xf32>
    %6 = vector.shape_cast %5 : vector<1x8x128xf32> to vector<8x128xf32>
    %c1_5 = arith.constant 1 : index
    %7 = memref.load %arg1[%c1_5] : memref<10xf32, #tpu.memory_space<smem>>
    %8 = vector.broadcast %7 : f32 to vector<8x128xf32>
    %9 = arith.mulf %6, %8 : vector<8x128xf32>
    %10 = arith.addf %4, %9 : vector<8x128xf32>
    %c2 = arith.constant 2 : index
    %c0_6 = arith.constant 0 : index
    %c0_7 = arith.constant 0 : index
    %11 = vector.load %arg3[%c2, %c0_6, %c0_7] : memref<10x8x128xf32, #tpu.memory_space<vmem>>, vector<1x8x128xf32>
    %12 = vector.shape_cast %11 : vector<1x8x128xf32> to vector<8x128xf32>
    %c2_8 = arith.constant 2 : index
    %13 = memref.load %arg1[%c2_8] : memref<10xf32, #tpu.memory_space<smem>>
    %14 = vector.broadcast %13 : f32 to vector<8x128xf32>
    %15 = arith.mulf %12, %14 : vector<8x128xf32>
    %16 = arith.addf %10, %15 : vector<8x128xf32>
    %c3 = arith.constant 3 : index
    %c0_9 = arith.constant 0 : index
    %c0_10 = arith.constant 0 : index
    %17 = vector.load %arg3[%c3, %c0_9, %c0_10] : memref<10x8x128xf32, #tpu.memory_space<vmem>>, vector<1x8x128xf32>
    %18 = vector.shape_cast %17 : vector<1x8x128xf32> to vector<8x128xf32>
    %c3_11 = arith.constant 3 : index
    %19 = memref.load %arg1[%c3_11] : memref<10xf32, #tpu.memory_space<smem>>
    %20 = vector.broadcast %19 : f32 to vector<8x128xf32>
    %21 = arith.mulf %18, %20 : vector<8x128xf32>
    %22 = arith.addf %16, %21 : vector<8x128xf32>
    %c4 = arith.constant 4 : index
    %c0_12 = arith.constant 0 : index
    %c0_13 = arith.constant 0 : index
    %23 = vector.load %arg3[%c4, %c0_12, %c0_13] : memref<10x8x128xf32, #tpu.memory_space<vmem>>, vector<1x8x128xf32>
    %24 = vector.shape_cast %23 : vector<1x8x128xf32> to vector<8x128xf32>
    %c4_14 = arith.constant 4 : index
    %25 = memref.load %arg1[%c4_14] : memref<10xf32, #tpu.memory_space<smem>>
    %26 = vector.broadcast %25 : f32 to vector<8x128xf32>
    %27 = arith.mulf %24, %26 : vector<8x128xf32>
    %28 = arith.addf %22, %27 : vector<8x128xf32>
    %c5 = arith.constant 5 : index
    %c0_15 = arith.constant 0 : index
    %c0_16 = arith.constant 0 : index
    %29 = vector.load %arg3[%c5, %c0_15, %c0_16] : memref<10x8x128xf32, #tpu.memory_space<vmem>>, vector<1x8x128xf32>
    %30 = vector.shape_cast %29 : vector<1x8x128xf32> to vector<8x128xf32>
    %c5_17 = arith.constant 5 : index
    %31 = memref.load %arg1[%c5_17] : memref<10xf32, #tpu.memory_space<smem>>
    %32 = vector.broadcast %31 : f32 to vector<8x128xf32>
    %33 = arith.mulf %30, %32 : vector<8x128xf32>
    %34 = arith.addf %28, %33 : vector<8x128xf32>
    %c6 = arith.constant 6 : index
    %c0_18 = arith.constant 0 : index
    %c0_19 = arith.constant 0 : index
    %35 = vector.load %arg3[%c6, %c0_18, %c0_19] : memref<10x8x128xf32, #tpu.memory_space<vmem>>, vector<1x8x128xf32>
    %36 = vector.shape_cast %35 : vector<1x8x128xf32> to vector<8x128xf32>
    %c6_20 = arith.constant 6 : index
    %37 = memref.load %arg1[%c6_20] : memref<10xf32, #tpu.memory_space<smem>>
    %38 = vector.broadcast %37 : f32 to vector<8x128xf32>
    %39 = arith.mulf %36, %38 : vector<8x128xf32>
    %40 = arith.addf %34, %39 : vector<8x128xf32>
    %c7 = arith.constant 7 : index
    %c0_21 = arith.constant 0 : index
    %c0_22 = arith.constant 0 : index
    %41 = vector.load %arg3[%c7, %c0_21, %c0_22] : memref<10x8x128xf32, #tpu.memory_space<vmem>>, vector<1x8x128xf32>
    %42 = vector.shape_cast %41 : vector<1x8x128xf32> to vector<8x128xf32>
    %c7_23 = arith.constant 7 : index
    %43 = memref.load %arg1[%c7_23] : memref<10xf32, #tpu.memory_space<smem>>
    %44 = vector.broadcast %43 : f32 to vector<8x128xf32>
    %45 = arith.mulf %42, %44 : vector<8x128xf32>
    %46 = arith.addf %40, %45 : vector<8x128xf32>
    %c8 = arith.constant 8 : index
    %c0_24 = arith.constant 0 : index
    %c0_25 = arith.constant 0 : index
    %47 = vector.load %arg3[%c8, %c0_24, %c0_25] : memref<10x8x128xf32, #tpu.memory_space<vmem>>, vector<1x8x128xf32>
    %48 = vector.shape_cast %47 : vector<1x8x128xf32> to vector<8x128xf32>
    %c8_26 = arith.constant 8 : index
    %49 = memref.load %arg1[%c8_26] : memref<10xf32, #tpu.memory_space<smem>>
    %50 = vector.broadcast %49 : f32 to vector<8x128xf32>
    %51 = arith.mulf %48, %50 : vector<8x128xf32>
    %52 = arith.addf %46, %51 : vector<8x128xf32>
    %c9 = arith.constant 9 : index
    %c0_27 = arith.constant 0 : index
    %c0_28 = arith.constant 0 : index
    %53 = vector.load %arg3[%c9, %c0_27, %c0_28] : memref<10x8x128xf32, #tpu.memory_space<vmem>>, vector<1x8x128xf32>
    %54 = vector.shape_cast %53 : vector<1x8x128xf32> to vector<8x128xf32>
    %c9_29 = arith.constant 9 : index
    %55 = memref.load %arg1[%c9_29] : memref<10xf32, #tpu.memory_space<smem>>
    %56 = vector.broadcast %55 : f32 to vector<8x128xf32>
    %57 = arith.mulf %54, %56 : vector<8x128xf32>
    %58 = arith.addf %52, %57 : vector<8x128xf32>
    %c0_30 = arith.constant 0 : index
    %59 = memref.load %arg2[%c0_30] : memref<1xf32, #tpu.memory_space<smem>>
    %60 = vector.broadcast %59 : f32 to vector<8x128xf32>
    %61 = arith.addf %58, %60 : vector<8x128xf32>
    %cst = arith.constant 5.000000e-01 : f32
    %62 = vector.broadcast %cst : f32 to vector<8x128xf32>
    %63 = arith.mulf %62, %61 : vector<8x128xf32>
    %64 = math.tanh %63 : vector<8x128xf32>
    %cst_31 = arith.constant 5.000000e-01 : f32
    %65 = vector.broadcast %cst_31 : f32 to vector<8x128xf32>
    %66 = arith.mulf %65, %64 : vector<8x128xf32>
    %cst_32 = arith.constant 5.000000e-01 : f32
    %67 = vector.broadcast %cst_32 : f32 to vector<8x128xf32>
    %68 = arith.addf %66, %67 : vector<8x128xf32>
    %c0_33 = arith.constant 0 : index
    %c0_34 = arith.constant 0 : index
    %69 = vector.load %arg4[%c0_33, %c0_34] : memref<8x128xf32, #tpu.memory_space<vmem>>, vector<8x128xf32>
    tpu.vector_store %arg4[%c0_33, %c0_34], %68 {strides = array<i32>} : memref<8x128xf32, #tpu.memory_space<vmem>>, vector<8x128xf32>,
    return
  }
  func.func @transform_0(%arg0: i32) -> i32 {
    %c0_i32 = arith.constant 0 : i32
    %c0_i32_0 = arith.constant 0 : i32
    return %c0_i32 : i32
  }
  func.func @transform_1(%arg0: i32) -> i32 {
    %c0_i32 = arith.constant 0 : i32
    %c0_i32_0 = arith.constant 0 : i32
    return %c0_i32 : i32
  }
  func.func @transform_2(%arg0: i32) -> (i32, i32, i32) {
    %c0_i32 = arith.constant 0 : i32
    %c0_i32_0 = arith.constant 0 : i32
    %c0_i32_1 = arith.constant 0 : i32
    return %c0_i32, %c0_i32_0, %arg0 : i32, i32, i32
  }
  func.func @transform_3(%arg0: i32) -> (i32, i32) {
    %c0_i32 = arith.constant 0 : i32
    %c0_i32_0 = arith.constant 0 : i32
    return %c0_i32, %arg0 : i32, i32
  }
}

</mosaic_0001>

<bundles_post_ra>
// kernel: simple_llm_forward.1
= control target key start
LH: loop header
LB: loop body
LE: loop exit
PB: predicated region body
PF: predicated region fallthrough
CT: control target
= control target key end

     0   :  { %9 = vsyncpa [#allocation4], 0  ;;  %s194_s0 = inlined_call_operand.vmem [shape: f32[10], index: 0, kind: input, shape index: {}]   ;;  %s195_s1 = inlined_call_operand.<no memory space> [shape: f32[1], index: 1, kind: input, shape index: {}]   ;;  %s196_s2 = inlined_call_operand.vmem [shape: f32[10,8,128], index: 2, kind: input, shape index: {}]   ;;  %s197_s3 = inlined_call_operand.vmem [shape: f32[8,128], index: 3, kind: output, shape index: {}]  }
   0x1   :  { %s16_s14 = sshll.u32 %s194_s0, 4  ;;  %s17_s14 = int_to_ptr.vmem [resolvable:$true] %s16_s14 }
   0x2   :  { %s120_s15 = scalar_lea.vmem %s17_s14, 16  ;;  %p125_p1 = scmp.lt.s32.totalorder %s17_s14, %s17_s14 }
   0x3   :  { %p121_p0 = scmp.ne.s32.totalorder %s17_s14, %s120_s15  ;;  %p126_p2 = scmp.lt.s32.totalorder %s120_s15, %s120_s15 }
   0x5   :  { %p127_p3 = por %p126_p2, %p125_p1 }
   0x7   :  { %p128_p4 = pnand %p127_p3, %p121_p0 }
   0x9   :  { %131 = shalt.err (!%p128_p4)
}
   0xa   :  { %s134_s16 = smov [#allocation3]  }
   0xb   :  { %19 = dma.vmem_to_smem %s17_s14, 16, %s134_s16, [#allocation4]  }
   0xc   :  { %132 = dma.done.wait [#allocation4], 16  }
   0xd   :  { %133 = vsyncadd [#allocation4], 4294967280 }
   0xe   :  { %27 = sfence }
   0xf   :  { %s29_s17 = sld [smem:[#allocation3]]  ;;  %s100_s18 = sld [smem:[#allocation3 + $0x1]]  ;;  %v28_v0 = vld [vmem:[%s196_s2] sm:$0xff]  ;;  %v99_v1 = vld [vmem:[%s196_s2 + $0x8] sm:$0xff]  ;;  %v101_v2 = vld [vmem:[%s196_s2 + $0x10] sm:$0xff]  ;;  %v87_v38 = vstv %s195_s1 }
  0x10   :  { %s102_s19 = sld [smem:[#allocation3 + $0x2]]  ;;  %s104_s20 = sld [smem:[#allocation3 + $0x3]]  ;;  %v103_v5 = vld [vmem:[%s196_s2 + $0x18] sm:$0xff]  ;;  %v105_v11 = vld [vmem:[%s196_s2 + $0x20] sm:$0xff]  ;;  %v107_v15 = vld [vmem:[%s196_s2 + $0x28] sm:$0xff] }
  0x11   :  { %s106_s21 = sld [smem:[#allocation3 + $0x4]]  ;;  %s108_s22 = sld [smem:[#allocation3 + $0x5]]  ;;  %v109_v19 = vld [vmem:[%s196_s2 + $0x30] sm:$0xff]  ;;  %v111_v23 = vld [vmem:[%s196_s2 + $0x38] sm:$0xff]  ;;  %v113_v27 = vld [vmem:[%s196_s2 + $0x40] sm:$0xff] }
  0x12   :  { %s110_s26 = sld [smem:[#allocation3 + $0x6]]  ;;  %s112_s4 = sld [smem:[#allocation3 + $0x7]]  ;;  %v115_v31 = vld [vmem:[%s196_s2 + $0x48] sm:$0xff] }
  0x13   :  { %s114_s7 = sld [smem:[#allocation3 + $0x8]]  ;;  %s116_s10 = sld [smem:[#allocation3 + $0x9]] }
  0x15   :  { %v30_v3 = vstv %s29_s17  ;;  %v35_v4 = vstv %s100_s18 }
  0x16   :  { %v31_v6 = vmul.f32 %v30_v3, %v28_v0  ;;  %v36_v7 = vmul.f32 %v99_v1, %v35_v4  ;;  %v41_v8 = vstv %s102_s19  ;;  %v47_v9 = vstv %s104_s20 }
  0x17   :  { %v42_v10 = vmul.f32 %v101_v2, %v41_v8  ;;  %v53_v12 = vstv %s106_s21  ;;  %v48_v14 = vmul.f32 %v103_v5, %v47_v9  ;;  %v59_v16 = vstv %s108_s22 }
  0x18   :  { %v37_v13 = vadd.f32 %v36_v7, %v31_v6  ;;  %v54_v18 = vmul.f32 %v105_v11, %v53_v12  ;;  %v65_v20 = vstv %s110_s26  ;;  %v60_v22 = vmul.f32 %v107_v15, %v59_v16 }
  0x19   :  { %v71_v24 = vstv %s112_s4  ;;  %v66_v26 = vmul.f32 %v109_v19, %v65_v20  ;;  %v77_v28 = vstv %s114_s7  ;;  %v83_v32 = vstv %s116_s10 }
  0x1a   :  { %v43_v17 = vadd.f32 %v42_v10, %v37_v13  ;;  %v72_v30 = vmul.f32 %v111_v23, %v71_v24  ;;  %v78_v34 = vmul.f32 %v113_v27, %v77_v28  ;;  %v84_v36 = vmul.f32 %v115_v31, %v83_v32 }
  0x1c   :  { %v49_v21 = vadd.f32 %v48_v14, %v43_v17 }
  0x1e   :  { %v55_v25 = vadd.f32 %v54_v18, %v49_v21 }
  0x20   :  { %v61_v29 = vadd.f32 %v60_v22, %v55_v25 }
  0x22   :  { %v67_v33 = vadd.f32 %v66_v26, %v61_v29 }
  0x24   :  { %v73_v35 = vadd.f32 %v72_v30, %v67_v33 }
  0x26   :  { %v79_v37 = vadd.f32 %v78_v34, %v73_v35 }
  0x28   :  { %v85_v39 = vadd.f32 %v84_v36, %v79_v37 }
  0x2a   :  { %v88_v40 = vadd.f32 %v87_v38, %v85_v39 }
  0x2c   :  { %v89_v41 = vmul.f32 0.5, %v88_v40 }
  0x2e   :  { %118 = vtanh.f32 %v89_v41 }
  0x38   :  { %v119_v42 = vpop.eup %118 }
  0x39   :  { %v91_v43 = vmul.f32 0.5, %v119_v42 }
  0x3b   :  { %v92_v44 = vadd.f32 0.5, %v91_v43 }
  0x3d   :  { %93 = vst [vmem:[%s197_s3] sm:$0xff] %v92_v44 }
  0x3e   :  { %98 = vsyncpa [#allocation4], 1 }

</bundles_post_ra>
